<compile_context>
chip_gen: v7x
topology: tpu7x:2x2x1
jax: 0.10.0
libtpu: 0.0.40
codegen_flags: <defaults>
</compile_context>

<pallas_src>
import math

import jax
import jax.numpy as jnp
from jax.experimental import pallas as pl
from jax.experimental.pallas import tpu as pltpu


def make_positional_encoding_table(d_model: int, max_len: int = 64) -> jnp.ndarray:
    """Build the pe buffer exactly as the PyTorch __init__ does."""
    if d_model % 2 != 0:
        # Same latent restriction as the PyTorch original (pe[:,1::2] would
        # shape-mismatch); fail loudly instead of silently diverging.
        raise ValueError("PositionalEncoding requires an even d_model")
    position = jnp.arange(0, max_len, dtype=jnp.float32)[:, None]            # (max_len, 1)
    div_term = jnp.exp(
        jnp.arange(0, d_model, 2, dtype=jnp.float32) * (-math.log(10000.0) / d_model)
    )                                                                        # (d_model//2,)
    angles = position * div_term                                             # (max_len, d_model//2)
    pe = jnp.zeros((max_len, d_model), dtype=jnp.float32)
    pe = pe.at[:, 0::2].set(jnp.sin(angles))
    pe = pe.at[:, 1::2].set(jnp.cos(angles))
    return pe


def _pe_add_kernel(x_ref, pe_ref, o_ref):
    # x_ref: (tb, tl) slab; pe_ref: (1, tl) resident f32 table tile.
    # (1, tl) + (tb, tl) is a cheap sublane broadcast; the add promotes to f32
    # (matching PyTorch's x + f32 buffer) and the store casts back to x dtype.
    o_ref[...] = (x_ref[...] + pe_ref[...]).astype(o_ref.dtype)


def _tpu_generation_defaults():
    """Generation-aware per-buffer budget / scoped-VMEM / megacore policy."""
    kind = ""
    try:
        kind = jax.devices()[0].device_kind.lower()
    except Exception:
        pass
    if "v7" in kind:
        # 2 TCs/chip, 64 MiB VMEM/TC (32 MiB default scoped): keep the
        # double-buffered in+out working set well under the scoped limit and
        # prefer an even number of grid steps so both cores stay busy.
        return {"budget": 4 << 20, "vmem_limit": None, "prefer_even_steps": True}
    if "v6" in kind:
        # 1 TC, 128 MiB VMEM: larger blocks amortize per-step overhead; raise
        # the scoped limit to hold the 4-buffer working set.
        return {"budget": 6 << 20, "vmem_limit": 64 << 20, "prefer_even_steps": False}
    if "v5" in kind:
        # 1 TC, 16 MiB default scoped VMEM: 4 x 3 MiB buffers + pe fits.
        return {"budget": 3 << 20, "vmem_limit": None, "prefer_even_steps": False}
    # Unknown part: be conservative.
    return {"budget": 2 << 20, "vmem_limit": None, "prefer_even_steps": False}


def _pick_tiles(B, L, itemsize, budget_bytes, prefer_even_steps):
    """Pick (batch_tile, lane_tile) obeying the (8,128) block rule and budget.

    lane_tile is either the full L (always legal) or a multiple of 128;
    batch_tile is either the full B or a multiple of 8.  Non-divisor tiles are
    allowed (grid uses cdiv; the last block is masked), which is correct for a
    pure elementwise add.
    """
    # --- lane tile ---
    min_rows = min(B, 8)
    max_lanes = max(1, budget_bytes // (min_rows * itemsize))
    if L <= max_lanes:
        tl = L                                   # full extent: always legal
    else:
        lane_cap = max(128, (max_lanes // 128) * 128)
        tl = 0
        for cand in range(lane_cap, 127, -128):  # prefer a divisor of L (no masked stores)
            if L % cand == 0:
                tl = cand
                break
        if tl == 0:
            tl = lane_cap                        # cdiv grid; last lane block masked

    # --- batch tile ---
    max_rows = max(1, budget_bytes // (tl * itemsize))
    candidates = set()
    if B <= max_rows:
        candidates.add(B)                        # whole batch in one block
    candidates.update(d for d in range(8, B, 8) if B % d == 0 and d <= max_rows)
    if not candidates:
        # No compliant divisor within budget: multiple-of-8 tile + cdiv grid.
        candidates.add(min(B, max(8, (max_rows // 8) * 8)))

    l_steps = -(-L // tl)

    def n_steps(tb):
        return (-(-B // tb)) * l_steps

    cand = sorted(candidates)
    if prefer_even_steps:
        even = [tb for tb in cand if n_steps(tb) % 2 == 0]
        if even:
            return max(even), tl
    return max(cand), tl


def positional_encoding_forward(
    x: jnp.ndarray,
    pe: jnp.ndarray,
    *,
    block_budget_bytes: int | None = None,   # per-buffer; default is generation-aware
    vmem_limit_bytes: int | None = None,
    donate_x: bool = False,
    min_kernel_bytes: int = 1 << 20,         # below this, skip pallas_call (let XLA fuse)
) -> jnp.ndarray:
    """x: (B, S, D); pe: (max_len, D). Returns x + pe[None, :S, :] in x.dtype."""
    B, S, D = x.shape
    if S > pe.shape[0]:
        raise ValueError(f"sequence length {S} exceeds max_len {pe.shape[0]}")

    pe_s = pe[:S, :].astype(jnp.float32)

    itemsize = jnp.dtype(x.dtype).itemsize
    total_bytes = B * S * D * itemsize
    if total_bytes < min_kernel_bytes:
        # Tiny inputs: fixed µs-scale pallas_call overhead dwarfs the traffic,
        # and plain XLA will fuse this add into neighboring ops.
        return (x + pe_s[None, :, :]).astype(x.dtype)

    defaults = _tpu_generation_defaults()
    budget = block_budget_bytes if block_budget_bytes is not None else defaults["budget"]
    vmem_limit = vmem_limit_bytes if vmem_limit_bytes is not None else defaults["vmem_limit"]

    # Glue in plain JAX: flatten to a lane-dense (B, S*D) slab (layout-preserving
    # reshape; pe's row layout matches the flattened x row exactly).
    L = S * D
    x2 = x.reshape(B, L)
    pe2 = pe_s.reshape(1, L)

    tb, tl = _pick_tiles(B, L, itemsize, budget, defaults["prefer_even_steps"])
    grid = (pl.cdiv(B, tb), pl.cdiv(L, tl))

    cost = pl.CostEstimate(
        flops=B * L,
        transcendentals=0,
        bytes_accessed=2 * B * L * itemsize + L * 4,   # read x + write out + read pe(f32)
    )

    compiler_kwargs = {"dimension_semantics": ("parallel", "parallel")}
    if vmem_limit is not None:
        compiler_kwargs["vmem_limit_bytes"] = vmem_limit

    out2 = pl.pallas_call(
        _pe_add_kernel,
        out_shape=jax.ShapeDtypeStruct((B, L), x.dtype),
        grid_spec=pltpu.PrefetchScalarGridSpec(
            num_scalar_prefetch=0,
            grid=grid,
            in_specs=[
                pl.BlockSpec((tb, tl), lambda b, l: (b, l)),   # batch/lane tile of x
                pl.BlockSpec((1, tl), lambda b, l: (0, l)),    # pe tile, follows lane axis
            ],
            out_specs=pl.BlockSpec((tb, tl), lambda b, l: (b, l)),
        ),
        compiler_params=pltpu.CompilerParams(**compiler_kwargs),
        cost_estimate=cost,
        input_output_aliases=({0: 0} if donate_x else {}),
    )(x2, pe2)

    return out2.reshape(B, S, D)


if __name__ == "__main__":
    d_model = 32
    max_len = 64
    batch = 2
    seq = 8

    pe = make_positional_encoding_table(d_model, max_len)

    key = jax.random.PRNGKey(0)
    x = jax.random.normal(key, (batch, seq, d_model), dtype=jnp.float32)

    # Force the Pallas path (the demo shape is tiny and would otherwise take
    # the small-input bypass).
    out = positional_encoding_forward(x, pe, min_kernel_bytes=0)
    out = jax.block_until_ready(out)

    # sanity check against the pure-JAX reference
    ref = x + pe[None, :seq, :]
    assert out.shape == (batch, seq, d_model)
    assert jnp.allclose(out, ref, atol=1e-6), "mismatch vs reference"

    print("KERNEL_OK")
</pallas_src>

<mosaic_0001>
module attributes {stable_mosaic.version = 11 : i64} {
  func.func @_pe_add_kernel(%arg0: i32, %arg1: i32, %arg2: memref<2x256xf32, #tpu.memory_space<vmem>>, %arg3: memref<1x256xf32, #tpu.memory_space<vmem>>, %arg4: memref<2x256xf32, #tpu.memory_space<vmem>>) attributes {dimension_semantics = [#tpu.dimension_semantics<parallel>, #tpu.dimension_semantics<parallel>], iteration_bounds = array<i64: 1, 1>, scalar_prefetch = 0 : i64, scratch_operands = 0 : i64, tpu.core_type = #tpu.core_type<tc>, window_params = [{transform_indices = @transform_0, window_bounds = array<i64: 2, 256>}, {transform_indices = @transform_1, window_bounds = array<i64: 1, 256>}, {transform_indices = @transform_2, window_bounds = array<i64: 2, 256>}]} {
    %c0 = arith.constant 0 : index
    %c0_0 = arith.constant 0 : index
    %0 = vector.load %arg2[%c0, %c0_0] : memref<2x256xf32, #tpu.memory_space<vmem>>, vector<2x256xf32>
    %c0_1 = arith.constant 0 : index
    %c0_2 = arith.constant 0 : index
    %1 = vector.load %arg3[%c0_1, %c0_2] : memref<1x256xf32, #tpu.memory_space<vmem>>, vector<1x256xf32>
    %2 = vector.broadcast %1 : vector<1x256xf32> to vector<2x256xf32>
    %3 = arith.addf %0, %2 : vector<2x256xf32>
    %c0_3 = arith.constant 0 : index
    %c0_4 = arith.constant 0 : index
    %4 = vector.load %arg4[%c0_3, %c0_4] : memref<2x256xf32, #tpu.memory_space<vmem>>, vector<2x256xf32>
    tpu.vector_store %arg4[%c0_3, %c0_4], %3 {strides = array<i32>} : memref<2x256xf32, #tpu.memory_space<vmem>>, vector<2x256xf32>,
    return
  }
  func.func @transform_0(%arg0: i32, %arg1: i32) -> (i32, i32) {
    %c0_i32 = arith.constant 0 : i32
    return %arg0, %arg1 : i32, i32
  }
  func.func @transform_1(%arg0: i32, %arg1: i32) -> (i32, i32) {
    %c0_i32 = arith.constant 0 : i32
    %c0_i32_0 = arith.constant 0 : i32
    return %c0_i32, %arg1 : i32, i32
  }
  func.func @transform_2(%arg0: i32, %arg1: i32) -> (i32, i32) {
    %c0_i32 = arith.constant 0 : i32
    return %arg0, %arg1 : i32, i32
  }
}

</mosaic_0001>

<bundles_post_ra>
// kernel: tpu_custom_call.1
= control target key start
LH: loop header
LB: loop body
LE: loop exit
PB: predicated region body
PF: predicated region fallthrough
CT: control target
= control target key end

     0   :  { %7 = vsyncpa [#allocation3], 0  ;;  %s157_s0 = inlined_call_operand.hbm [shape: f32[2,256], index: 0, kind: input, shape index: {}]   ;;  %s158_s1 = inlined_call_operand.vmem [shape: f32[1,256], index: 1, kind: input, shape index: {}]   ;;  %s159_s2 = inlined_call_operand.hbm [shape: f32[2,256], index: 2, kind: output, shape index: {}]  }
   0x1   :  { %8 = vsyncpa [#allocation4], 0  ;;  %s112_s9 = smov [#allocation2]   ;;  %s64_s13 = scalar_lea.hbm %s157_s0, 64 }
   0x2   :  { %s15_s10 = sshll.u32 %s112_s9, 4  ;;  %p65_p0 = scmp.ne.s32.totalorder %s157_s0, %s64_s13  ;;  %s16_s10 = int_to_ptr.vmem [resolvable:$true] %s15_s10 }
   0x3   :  { %p68_p1 = scmp.lt.u32.totalorder %s64_s13, %s157_s0 }
   0x5   :  { %p70_p2 = pnand %p68_p1, %p65_p0 }
   0x7   :  { %73 = shalt.err (!%p70_p2)
}
   0x8   :  { %s74_s18 = scalar_lea.vmem %s16_s10, 64  ;;  %p79_p4 = scmp.lt.s32.totalorder %s16_s10, %s16_s10 }
   0x9   :  { %p75_p3 = scmp.ne.s32.totalorder %s16_s10, %s74_s18  ;;  %p80_p5 = scmp.lt.s32.totalorder %s74_s18, %s74_s18 }
   0xb   :  { %p81_p6 = por %p80_p5, %p79_p4 }
   0xd   :  { %p82_p7 = pnand %p81_p6, %p75_p3 }
   0xf   :  { %85 = shalt.err (!%p82_p7)
}
  0x10   :  { %18 = dma.hbm_to_vmem [thread:$0]  %s157_s0, 64, %s16_s10, [#allocation3]  }
  0x11   :  { %108 = dma.done.wait [#allocation3], 64  }
  0x12   :  { %109 = vsyncadd [#allocation3], 4294967232  ;;  %v27_v0 = vlaneseq  ;;  %v113_v1 = vmov 1983009808   ;;  %v25_v7 = vld [vmem:[%s158_s1] sm:$0x3] }
  0x13   :  { %v37_v2 = vunpack.c.l.s4 %v113_v1  ;;  %v24_v12 = vld [vmem:[#allocation2] sm:$0xf]  ;;  %s114_s23 = smov [#allocation5]  }
  0x14   :  { %v28_v3 = vshrl.u32 %v27_v0, 7  ;;  %s52_s0 = sshll.u32 %s114_s23, 4  ;;  %s53_s0 = int_to_ptr.vmem [resolvable:$true] %s52_s0 }
  0x15   :  { %v38_v6 = vunpack.c.0.s8 %v37_v2  ;;  %s86_s24 = scalar_lea.vmem %s53_s0, 64  ;;  %p91_p9 = scmp.lt.s32.totalorder %s53_s0, %s53_s0 }
  0x16   :  { %v29_v4 = vsub.s32 0, %v28_v3  ;;  %v33_v5 = vsub.s32 1, %v28_v3  ;;  %p87_p8 = scmp.ne.s32.totalorder %s53_s0, %s86_s24  ;;  %p92_p10 = scmp.lt.s32.totalorder %s86_s24, %s86_s24 }
  0x17   :  { %v41_v10 = vsub.s32 %v38_v6, %v28_v3 }
  0x18   :  { %v30_v8 = vrot.slane %v25_v7, %v29_v4  ;;  %v34_v9 = vrot.slane %v25_v7, %v33_v5  ;;  %p93_p11 = por %p92_p10, %p91_p9 }
  0x1a   :  { %v35_v11 = vcombine.low %v30_v8, %v34_v9  ;;  %p94_p12 = pnand %p93_p11, %p87_p8 }
  0x1c   :  { %v42_v13 = vrot.slane %v35_v11, %v41_v10 }
  0x1e   :  { %v44_v14 = vadd.f32 %v42_v13, %v24_v12 }
  0x20   :  { %45 = vst [vmem:[#allocation5] sm:$0xf] %v44_v14 }
  0x21   :  { %97 = shalt.err (!%p94_p12)
}
  0x22   :  { %s98_s26 = scalar_lea.hbm %s159_s2, 64 }
  0x23   :  { %p99_p13 = scmp.ne.s32.totalorder %s159_s2, %s98_s26  ;;  %p102_p0 = scmp.lt.u32.totalorder %s98_s26, %s159_s2 }
  0x25   :  { %p104_p1 = pnand %p102_p0, %p99_p13 }
  0x27   :  { %107 = shalt.err (!%p104_p1)
}
  0x28   :  { %55 = dma.vmem_to_hbm [thread:$0]  %s53_s0, 64, %s159_s2, [#allocation4]  }
  0x29   :  { %110 = dma.done.wait [#allocation4], 64  }
  0x2a   :  { %111 = vsyncadd [#allocation4], 4294967232 }
  0x2b   :  { %59 = vsyncpa [#allocation3], 1 }
  0x2c   :  { %60 = vsyncpa [#allocation4], 1 }

</bundles_post_ra>
